<compile_context>
chip_gen: v6e
topology: v6e:2x2x1
jax: 0.10.0
libtpu: 0.0.40
codegen_flags: <defaults>
</compile_context>

<pallas_src>
import functools

import jax
import jax.numpy as jnp
import numpy as np
from jax.experimental import pallas as pl
from jax.experimental.pallas import tpu as pltpu


# --------------------------------- kernel ----------------------------------

def _indexing_head_kernel(ent_feat_ref,   # (1, 9, n_ent_pad)  f32 entity features
                          ent_prob_ref,   # (1, 3C, n_ent_pad) bf16 [hi, hi, lo]
                          rel_feat_ref,   # (1, 1, tile_r, 8)  f32 relation features
                          rel_dist_ref,   # (1, 1, tile_r, 3C) bf16 [hi, lo, hi]
                          out_ref,        # (1, 1, tile_r, n_ent_pad) raw scores
                          *, refine_recip):
    def recip(x):
        r = pl.reciprocal(x, approx=True)            # EUP slot (nearly free)
        if refine_recip:
            r = r * (2.0 - x * r)                    # optional Newton step
        return r

    # ---- entity side (precomputed in wrapper; entity axis on lanes) --------
    ef = ent_feat_ref[0]                             # (9, n_ent_pad)
    ex0, ey0, ex1, ey1 = ef[0:1], ef[1:2], ef[2:3], ef[3:4]
    area_e = ef[4:5]
    ecx, ecy = ef[5:6], ef[6:7]                      # centers (scaled or normed)
    ent_score = ef[7:8]
    ep2 = ef[8:9]                                    # sum(ent_prob^2)

    # ---- relation side (precomputed in wrapper) -----------------------------
    rf = rel_feat_ref[0, 0]                          # (tile_r, 8)
    rx0, ry0, rx1, ry1 = rf[:, 0:1], rf[:, 1:2], rf[:, 2:3], rf[:, 3:4]
    area_r = rf[:, 4:5]
    rvx, rvy = rf[:, 5:6], rf[:, 6:7]                # rel-vec endpoint (this side)
    rd2 = rf[:, 7:8]                                 # sum(rel_dist^2)

    # match_rel_vec denominator: |dx| + |dy| + 1
    den_vec = jnp.abs(rvx - ecx) + jnp.abs(rvy - ecy) + 1.0

    # cdist(rel_dist, ent_prob) via one packed bf16x3 MXU matmul
    cross = jnp.dot(rel_dist_ref[0, 0], ent_prob_ref[0],
                    preferred_element_type=jnp.float32)
    d2 = jnp.maximum(rd2 + ep2 - 2.0 * cross, 0.0)   # clamp: expansion cancellation
    den_cls = jnp.sqrt(d2) + 1.0

    # fused: ent_score / ((|dx|+|dy|+1) * (cdist+1))  -> one reciprocal
    score = ent_score * recip(den_vec * den_cls)

    # pairwise generalized IoU (rel aux box vs entity box), one reciprocal over
    # the common denominator union * area_c
    iw = jnp.maximum(jnp.minimum(rx1, ex1) - jnp.maximum(rx0, ex0), 0.0)
    ih = jnp.maximum(jnp.minimum(ry1, ey1) - jnp.maximum(ry0, ey0), 0.0)
    inter = iw * ih
    union = area_r + area_e - inter
    cw = jnp.maximum(jnp.maximum(rx1, ex1) - jnp.minimum(rx0, ex0), 0.0)
    ch = jnp.maximum(jnp.maximum(ry1, ey1) - jnp.minimum(ry0, ey0), 0.0)
    area_c = cw * ch
    giou = (inter * area_c - (area_c - union) * union) * recip(union * area_c)

    out_ref[0, 0] = (score * jnp.maximum(giou, 0.0)).astype(out_ref.dtype)
    # TODO(synk): debug-only branches of the PyTorch module (pickle dump of
    # degenerate boxes, NaN/Inf printing of match_cost_details) are omitted.


# ------------------------------ host wrapper --------------------------------

def _round_up(x, m):
    return ((x + m - 1) // m) * m


def _edge_pad_axis(x, axis, n):
    pad = n - x.shape[axis]
    if pad:
        cfg = [(0, 0)] * x.ndim
        cfg[axis] = (0, pad)
        x = jnp.pad(x, cfg, mode="edge")      # clones valid entries: no degenerate
    return x                                  # boxes, min/max untouched


def entities_indexing_head_rule_based(outputs, target_sizes, *, num_ent_class,
                                      normed_rel_vec_dist=False,
                                      refine_reciprocal=False,
                                      score_dtype=jnp.float32):
    f32 = jnp.float32
    pred_boxes = outputs["pred_boxes"].astype(f32)             # (B, N_ent, 4) cxcywh
    pred_logits = outputs["pred_logits"].astype(f32)           # (B, N_ent, C_logit)
    rel_s_logits = outputs["pred_rel_sub_logits"].astype(f32)  # (B, N_rel, C_rel)
    rel_o_logits = outputs["pred_rel_obj_logits"].astype(f32)
    rel_s_box = outputs["pred_rel_sub_box"].astype(f32)        # (B, N_rel, 4) cxcywh
    rel_o_box = outputs["pred_rel_obj_box"].astype(f32)
    rel_vec = outputs["pred_rel_vec"].astype(f32)              # (B, N_rel, 4)
    ts = target_sizes.astype(f32)                              # (B, 2) = (h, w)

    B, N_ent, _ = pred_boxes.shape
    N_rel = rel_vec.shape[1]
    img_h = ts[:, 0][:, None]                                  # (B, 1)
    img_w = ts[:, 1][:, None]

    # ---------------- entity-side prep (shared by sub & obj sides) ----------
    ent_prob = outputs.get("pred_probs")
    if ent_prob is None:
        ent_prob = jax.nn.softmax(pred_logits, axis=-1)
    else:
        ent_prob = ent_prob.astype(f32)
    if num_ent_class != ent_prob.shape[-1]:
        ent_prob = ent_prob[..., :-1]                          # drop background
    ent_score = jnp.max(ent_prob, axis=-1)                     # (B, N_ent)
    ep2 = jnp.sum(ent_prob * ent_prob, axis=-1)                # (B, N_ent)

    e_cx, e_cy, e_w, e_h = (pred_boxes[..., i] for i in range(4))
    ex0 = (e_cx - 0.5 * e_w) * img_w
    ey0 = (e_cy - 0.5 * e_h) * img_h
    ex1 = (e_cx + 0.5 * e_w) * img_w
    ey1 = (e_cy + 0.5 * e_h) * img_h
    area_e = (ex1 - ex0) * (ey1 - ey0)
    if normed_rel_vec_dist:
        ecx, ecy = e_cx, e_cy                                  # normalized centers
    else:
        ecx, ecy = (ex0 + ex1) * 0.5, (ey0 + ey1) * 0.5        # scaled centers

    ent_feat = jnp.stack(
        [ex0, ey0, ex1, ey1, area_e, ecx, ecy, ent_score, ep2], axis=1)  # (B,9,N_ent)

    # bf16x3 hi/lo split done here, packed along the class axis so the kernel
    # needs exactly one MXU matmul and zero operand-prep VALU ops.
    ep_t = jnp.transpose(ent_prob, (0, 2, 1))                  # (B, C, N_ent)
    ep_hi = ep_t.astype(jnp.bfloat16)
    ep_lo = (ep_t - ep_hi.astype(f32)).astype(jnp.bfloat16)
    ent_prob_mx = jnp.concatenate([ep_hi, ep_hi, ep_lo], axis=1)   # (B, 3C, N_ent)

    # ---------------- relation-side prep ({sub, obj} stacked on axis 1) ------
    def rel_dist_of(logits):
        if num_ent_class == logits.shape[-1]:
            return jax.nn.sigmoid(logits)                      # stable sigmoid
        return jax.nn.softmax(logits, axis=-1)[..., :-1]

    def rel_geom_of(box, vec_xy):
        r_cx, r_cy, r_w, r_h = (box[..., i] for i in range(4))
        rx0 = (r_cx - 0.5 * r_w) * img_w
        ry0 = (r_cy - 0.5 * r_h) * img_h
        rx1 = (r_cx + 0.5 * r_w) * img_w
        ry1 = (r_cy + 0.5 * r_h) * img_h
        area_r = (rx1 - rx0) * (ry1 - ry0)
        if normed_rel_vec_dist:
            rvx, rvy = vec_xy[..., 0], vec_xy[..., 1]
        else:
            rvx, rvy = vec_xy[..., 0] * img_w, vec_xy[..., 1] * img_h
        return jnp.stack([rx0, ry0, rx1, ry1, area_r, rvx, rvy], axis=-1)

    rel_dist = jnp.stack([rel_dist_of(rel_s_logits), rel_dist_of(rel_o_logits)],
                         axis=1)                               # (B, 2, N_rel, C)
    rd2 = jnp.sum(rel_dist * rel_dist, axis=-1)                # (B, 2, N_rel)
    rel_feat = jnp.stack([rel_geom_of(rel_s_box, rel_vec[..., 0:2]),
                          rel_geom_of(rel_o_box, rel_vec[..., 2:4])], axis=1)
    rel_feat = jnp.concatenate([rel_feat, rd2[..., None]], axis=-1)   # (B,2,N_rel,8)

    rd_hi = rel_dist.astype(jnp.bfloat16)
    rd_lo = (rel_dist - rd_hi.astype(f32)).astype(jnp.bfloat16)
    rel_dist_mx = jnp.concatenate([rd_hi, rd_lo, rd_hi], axis=-1)     # (B,2,N_rel,3C)

    # ---------------- padding & tiling ---------------------------------------
    n_ent_pad = _round_up(N_ent, 128)                  # lane-dense output stores
    tile_r = min(_round_up(N_rel, 16), 128)            # rel rows per grid step
    n_rel_pad = _round_up(N_rel, tile_r)
    n_tiles = n_rel_pad // tile_r

    ent_feat = _edge_pad_axis(ent_feat, 2, n_ent_pad)
    ent_prob_mx = _edge_pad_axis(ent_prob_mx, 2, n_ent_pad)
    rel_feat = _edge_pad_axis(rel_feat, 2, n_rel_pad)
    rel_dist_mx = _edge_pad_axis(rel_dist_mx, 2, n_rel_pad)
    c3 = ent_prob_mx.shape[1]                          # 3 * num classes

    # Right-sized VMEM budget from the actual (double-buffered) block footprint
    # plus live full-tile temporaries; clamped to the v6e/v7x scoped default.
    est = 2 * (tile_r * n_ent_pad * 4                  # out block
               + 16 * n_ent_pad * 4                    # ent_feat
               + _round_up(c3, 16) * n_ent_pad * 2     # ent_prob_mx (bf16)
               + tile_r * 128 * 4                      # rel_feat (lane-padded)
               + tile_r * max(128, c3) * 2)            # rel_dist_mx (bf16)
    est += 8 * tile_r * n_ent_pad * 4                  # live full-tile temporaries
    vmem_limit = int(min(max(2 * est, 8 << 20), 32 << 20))
    # TODO(synk): if N_ent grows past a few thousand, add an n_ent tile axis.

    grid_spec = pltpu.PrefetchScalarGridSpec(
        num_scalar_prefetch=0,
        grid=(B, 2, n_tiles),                          # (image, {sub,obj}, rel tile)
        in_specs=[
            pl.BlockSpec((1, 9, n_ent_pad), lambda b, s, t: (b, 0, 0)),
            pl.BlockSpec((1, c3, n_ent_pad), lambda b, s, t: (b, 0, 0)),
            pl.BlockSpec((1, 1, tile_r, 8), lambda b, s, t: (b, s, t, 0)),
            pl.BlockSpec((1, 1, tile_r, c3), lambda b, s, t: (b, s, t, 0)),
        ],
        out_specs=pl.BlockSpec((1, 1, tile_r, n_ent_pad),
                               lambda b, s, t: (b, s, t, 0)),
    )

    raw = pl.pallas_call(
        functools.partial(_indexing_head_kernel, refine_recip=refine_reciprocal),
        grid_spec=grid_spec,
        out_shape=jax.ShapeDtypeStruct((B, 2, n_rel_pad, n_ent_pad), score_dtype),
        compiler_params=pltpu.CompilerParams(
            dimension_semantics=("parallel", "parallel", "parallel"),
            vmem_limit_bytes=vmem_limit),
    )(ent_feat, ent_prob_mx, rel_feat, rel_dist_mx)

    # Per-image, per-side min-max normalization over the valid region (raw
    # scores come back unnormalized so the rel axis could be tiled above).
    valid = raw[:, :, :N_rel, :N_ent].astype(f32)
    mn = jnp.min(valid, axis=(2, 3), keepdims=True)
    mx = jnp.max(valid, axis=(2, 3), keepdims=True)
    normed = (valid - mn) / (mx - mn + 1e-5)
    return normed[:, 0], normed[:, 1]                  # sub_dist_mat, obj_dist_mat


# ---------------------- pure-JAX reference (for checking) -------------------

def _ref_forward(outputs, target_sizes, num_ent_class, normed_rel_vec_dist=False):
    def cxcywh_to_xyxy(x):
        cx, cy, w, h = x[..., 0], x[..., 1], x[..., 2], x[..., 3]
        return jnp.stack([cx - 0.5 * w, cy - 0.5 * h, cx + 0.5 * w, cy + 0.5 * h], -1)

    def giou(a, b):
        area_a = (a[:, 2] - a[:, 0]) * (a[:, 3] - a[:, 1])
        area_b = (b[:, 2] - b[:, 0]) * (b[:, 3] - b[:, 1])
        lt = jnp.maximum(a[:, None, :2], b[None, :, :2])
        rb = jnp.minimum(a[:, None, 2:], b[None, :, 2:])
        wh = jnp.clip(rb - lt, 0)
        inter = wh[..., 0] * wh[..., 1]
        union = area_a[:, None] + area_b[None, :] - inter
        iou = inter / union
        lt2 = jnp.minimum(a[:, None, :2], b[None, :, :2])
        rb2 = jnp.maximum(a[:, None, 2:], b[None, :, 2:])
        wh2 = jnp.clip(rb2 - lt2, 0)
        area_c = wh2[..., 0] * wh2[..., 1]
        return iou - (area_c - union) / area_c

    subs, objs = [], []
    B = target_sizes.shape[0]
    for ind in range(B):
        h, w = target_sizes[ind, 0], target_sizes[ind, 1]
        scale = jnp.stack([w, h, w, h]).astype(jnp.float32)
        ent_box = cxcywh_to_xyxy(outputs["pred_boxes"][ind]) * scale
        ent_cnter = (ent_box[:, :2] + ent_box[:, 2:]) * 0.5
        ent_cnter_n = outputs["pred_boxes"][ind][:, :2]
        ent_prob = jax.nn.softmax(outputs["pred_logits"][ind], -1)
        if num_ent_class != ent_prob.shape[-1]:
            ent_prob = ent_prob[:, :-1]
        ent_score = ent_prob.max(-1)

        def side(logits, box, vec2, vec2_n):
            if num_ent_class == logits.shape[-1]:
                rel_dist = jax.nn.sigmoid(logits)
            else:
                rel_dist = jax.nn.softmax(logits, -1)[:, :-1]
            rel_box = cxcywh_to_xyxy(box) * scale
            if normed_rel_vec_dist:
                d = jnp.abs(vec2_n[:, None, :] - ent_cnter_n[None, :, :])
            else:
                d = jnp.abs(vec2[:, None, :] - ent_cnter[None, :, :])
            match_rel_vec = 1.0 / (d[..., 0] + d[..., 1] + 1.0)
            match_conf = ent_score[None, :] * match_rel_vec
            cd = jnp.sqrt(jnp.sum((rel_dist[:, None, :] - ent_prob[None, :, :]) ** 2, -1))
            match_cls = 1.0 / (cd + 1.0)
            g = jnp.clip(giou(rel_box, ent_box), 0)
            scr = match_cls * g * match_conf
            return (scr - scr.min()) / (scr.max() - scr.min() + 1e-5)

        rv = outputs["pred_rel_vec"][ind] * scale
        rvn = outputs["pred_rel_vec"][ind]
        subs.append(side(outputs["pred_rel_sub_logits"][ind],
                         outputs["pred_rel_sub_box"][ind], rv[:, :2], rvn[:, :2]))
        objs.append(side(outputs["pred_rel_obj_logits"][ind],
                         outputs["pred_rel_obj_box"][ind], rv[:, 2:], rvn[:, 2:]))
    return jnp.stack(subs), jnp.stack(objs)


# ----------------------------------- main -----------------------------------

if __name__ == "__main__":
    key = jax.random.PRNGKey(0)
    B, N_ent, N_rel, C = 2, 16, 8, 4          # num_ent_class = 4, logits carry +1 bg
    ks = jax.random.split(key, 8)

    def rand_box(k, n):
        cxcy = jax.random.uniform(k, (B, n, 2), jnp.float32, 0.2, 0.8)
        wh = jax.random.uniform(jax.random.fold_in(k, 1), (B, n, 2), jnp.float32, 0.05, 0.3)
        return jnp.concatenate([cxcy, wh], -1)

    outputs = {
        "pred_boxes": rand_box(ks[0], N_ent),
        "pred_logits": jax.random.normal(ks[1], (B, N_ent, C + 1), jnp.float32),
        "pred_rel_sub_logits": jax.random.normal(ks[2], (B, N_rel, C + 1), jnp.float32),
        "pred_rel_obj_logits": jax.random.normal(ks[3], (B, N_rel, C + 1), jnp.float32),
        "pred_rel_sub_box": rand_box(ks[4], N_rel),
        "pred_rel_obj_box": rand_box(ks[5], N_rel),
        "pred_rel_vec": jax.random.uniform(ks[6], (B, N_rel, 4), jnp.float32, 0.1, 0.9),
    }
    target_sizes = jnp.array([[480.0, 640.0], [600.0, 800.0]], jnp.float32)  # (h, w)

    sub_mat, obj_mat = entities_indexing_head_rule_based(
        outputs, target_sizes, num_ent_class=C, normed_rel_vec_dist=False)
    jax.block_until_ready((sub_mat, obj_mat))

    ref_sub, ref_obj = _ref_forward(outputs, target_sizes, C, False)
    # Approx (EUP) reciprocals only (no Newton refinement) -> ~1e-3-level error.
    np.testing.assert_allclose(np.asarray(sub_mat), np.asarray(ref_sub), rtol=2e-3, atol=2e-3)
    np.testing.assert_allclose(np.asarray(obj_mat), np.asarray(ref_obj), rtol=2e-3, atol=2e-3)
    print("KERNEL_OK")
</pallas_src>

<mosaic_0001>
module attributes {stable_mosaic.version = 11 : i64} {
  func.func @_indexing_head_kernel(%arg0: i32, %arg1: i32, %arg2: i32, %arg3: memref<1x9x128xf32, #tpu.memory_space<vmem>>, %arg4: memref<1x12x128xbf16, #tpu.memory_space<vmem>>, %arg5: memref<1x1x16x8xf32, #tpu.memory_space<vmem>>, %arg6: memref<1x1x16x12xbf16, #tpu.memory_space<vmem>>, %arg7: memref<1x1x16x128xf32, #tpu.memory_space<vmem>>) attributes {dimension_semantics = [#tpu.dimension_semantics<parallel>, #tpu.dimension_semantics<parallel>, #tpu.dimension_semantics<parallel>], iteration_bounds = array<i64: 2, 2, 1>, scalar_prefetch = 0 : i64, scratch_operands = 0 : i64, tpu.core_type = #tpu.core_type<tc>, window_params = [{transform_indices = @transform_0, window_bounds = array<i64: 1, 9, 128>}, {transform_indices = @transform_1, window_bounds = array<i64: 1, 12, 128>}, {transform_indices = @transform_2, window_bounds = array<i64: 1, 1, 16, 8>}, {transform_indices = @transform_3, window_bounds = array<i64: 1, 1, 16, 12>}, {transform_indices = @transform_4, window_bounds = array<i64: 1, 1, 16, 128>}]} {
    %c0 = arith.constant 0 : index
    %c0_0 = arith.constant 0 : index
    %c0_1 = arith.constant 0 : index
    %0 = vector.load %arg3[%c0, %c0_0, %c0_1] : memref<1x9x128xf32, #tpu.memory_space<vmem>>, vector<1x9x128xf32>
    %1 = vector.shape_cast %0 : vector<1x9x128xf32> to vector<9x128xf32>
    %2 = vector.extract_strided_slice %1 {offsets = [0, 0], sizes = [1, 128], strides = [1, 1]} : vector<9x128xf32> to vector<1x128xf32>
    %3 = vector.extract_strided_slice %1 {offsets = [1, 0], sizes = [1, 128], strides = [1, 1]} : vector<9x128xf32> to vector<1x128xf32>
    %4 = vector.extract_strided_slice %1 {offsets = [2, 0], sizes = [1, 128], strides = [1, 1]} : vector<9x128xf32> to vector<1x128xf32>
    %5 = vector.extract_strided_slice %1 {offsets = [3, 0], sizes = [1, 128], strides = [1, 1]} : vector<9x128xf32> to vector<1x128xf32>
    %6 = vector.extract_strided_slice %1 {offsets = [4, 0], sizes = [1, 128], strides = [1, 1]} : vector<9x128xf32> to vector<1x128xf32>
    %7 = vector.extract_strided_slice %1 {offsets = [5, 0], sizes = [1, 128], strides = [1, 1]} : vector<9x128xf32> to vector<1x128xf32>
    %8 = vector.extract_strided_slice %1 {offsets = [6, 0], sizes = [1, 128], strides = [1, 1]} : vector<9x128xf32> to vector<1x128xf32>
    %9 = vector.extract_strided_slice %1 {offsets = [7, 0], sizes = [1, 128], strides = [1, 1]} : vector<9x128xf32> to vector<1x128xf32>
    %10 = vector.extract_strided_slice %1 {offsets = [8, 0], sizes = [1, 128], strides = [1, 1]} : vector<9x128xf32> to vector<1x128xf32>
    %c0_2 = arith.constant 0 : index
    %c0_3 = arith.constant 0 : index
    %c0_4 = arith.constant 0 : index
    %c0_5 = arith.constant 0 : index
    %11 = vector.load %arg5[%c0_2, %c0_3, %c0_4, %c0_5] : memref<1x1x16x8xf32, #tpu.memory_space<vmem>>, vector<1x1x16x8xf32>
    %12 = vector.shape_cast %11 : vector<1x1x16x8xf32> to vector<16x8xf32>
    %13 = vector.extract_strided_slice %12 {offsets = [0, 0], sizes = [16, 1], strides = [1, 1]} : vector<16x8xf32> to vector<16x1xf32>
    %14 = vector.extract_strided_slice %12 {offsets = [0, 1], sizes = [16, 1], strides = [1, 1]} : vector<16x8xf32> to vector<16x1xf32>
    %15 = vector.extract_strided_slice %12 {offsets = [0, 2], sizes = [16, 1], strides = [1, 1]} : vector<16x8xf32> to vector<16x1xf32>
    %16 = vector.extract_strided_slice %12 {offsets = [0, 3], sizes = [16, 1], strides = [1, 1]} : vector<16x8xf32> to vector<16x1xf32>
    %17 = vector.extract_strided_slice %12 {offsets = [0, 4], sizes = [16, 1], strides = [1, 1]} : vector<16x8xf32> to vector<16x1xf32>
    %18 = vector.extract_strided_slice %12 {offsets = [0, 5], sizes = [16, 1], strides = [1, 1]} : vector<16x8xf32> to vector<16x1xf32>
    %19 = vector.extract_strided_slice %12 {offsets = [0, 6], sizes = [16, 1], strides = [1, 1]} : vector<16x8xf32> to vector<16x1xf32>
    %20 = vector.extract_strided_slice %12 {offsets = [0, 7], sizes = [16, 1], strides = [1, 1]} : vector<16x8xf32> to vector<16x1xf32>
    %21 = vector.broadcast %18 : vector<16x1xf32> to vector<16x128xf32>
    %22 = vector.broadcast %7 : vector<1x128xf32> to vector<16x128xf32>
    %23 = arith.subf %21, %22 : vector<16x128xf32>
    %24 = math.absf %23 : vector<16x128xf32>
    %25 = vector.broadcast %19 : vector<16x1xf32> to vector<16x128xf32>
    %26 = vector.broadcast %8 : vector<1x128xf32> to vector<16x128xf32>
    %27 = arith.subf %25, %26 : vector<16x128xf32>
    %28 = math.absf %27 : vector<16x128xf32>
    %29 = arith.addf %24, %28 : vector<16x128xf32>
    %cst = arith.constant 1.000000e+00 : f32
    %30 = vector.broadcast %cst : f32 to vector<16x128xf32>
    %31 = arith.addf %29, %30 : vector<16x128xf32>
    %c0_6 = arith.constant 0 : index
    %c0_7 = arith.constant 0 : index
    %c0_8 = arith.constant 0 : index
    %c0_9 = arith.constant 0 : index
    %32 = vector.load %arg6[%c0_6, %c0_7, %c0_8, %c0_9] : memref<1x1x16x12xbf16, #tpu.memory_space<vmem>>, vector<1x1x16x12xbf16>
    %33 = vector.shape_cast %32 : vector<1x1x16x12xbf16> to vector<16x12xbf16>
    %c0_10 = arith.constant 0 : index
    %c0_11 = arith.constant 0 : index
    %c0_12 = arith.constant 0 : index
    %34 = vector.load %arg4[%c0_10, %c0_11, %c0_12] : memref<1x12x128xbf16, #tpu.memory_space<vmem>>, vector<1x12x128xbf16>
    %35 = vector.shape_cast %34 : vector<1x12x128xbf16> to vector<12x128xbf16>
    %cst_13 = arith.constant dense<0.000000e+00> : vector<16x128xf32>
    %36 = tpu.matmul %33, %35, %cst_13 {dimension_numbers = #tpu.dot_dimension_numbers<[1], [0], [0], [1], [0, 0, 1, 1], [], []>} : vector<16x12xbf16>, vector<12x128xbf16>, vector<16x128xf32> -> vector<16x128xf32>
    %37 = vector.broadcast %20 : vector<16x1xf32> to vector<16x128xf32>
    %38 = vector.broadcast %10 : vector<1x128xf32> to vector<16x128xf32>
    %39 = arith.addf %37, %38 : vector<16x128xf32>
    %cst_14 = arith.constant 2.000000e+00 : f32
    %40 = vector.broadcast %cst_14 : f32 to vector<16x128xf32>
    %41 = arith.mulf %40, %36 : vector<16x128xf32>
    %42 = arith.subf %39, %41 : vector<16x128xf32>
    %cst_15 = arith.constant 0.000000e+00 : f32
    %43 = vector.broadcast %cst_15 : f32 to vector<16x128xf32>
    %44 = arith.maximumf %42, %43 : vector<16x128xf32>
    %45 = math.sqrt %44 : vector<16x128xf32>
    %cst_16 = arith.constant 1.000000e+00 : f32
    %46 = vector.broadcast %cst_16 : f32 to vector<16x128xf32>
    %47 = arith.addf %45, %46 : vector<16x128xf32>
    %48 = arith.mulf %31, %47 : vector<16x128xf32>
    %49 = tpu.reciprocal %48 {approx = true} : vector<16x128xf32> -> vector<16x128xf32>
    %50 = vector.broadcast %9 : vector<1x128xf32> to vector<16x128xf32>
    %51 = arith.mulf %50, %49 : vector<16x128xf32>
    %52 = vector.broadcast %15 : vector<16x1xf32> to vector<16x128xf32>
    %53 = vector.broadcast %4 : vector<1x128xf32> to vector<16x128xf32>
    %54 = arith.minimumf %52, %53 : vector<16x128xf32>
    %55 = vector.broadcast %13 : vector<16x1xf32> to vector<16x128xf32>
    %56 = vector.broadcast %2 : vector<1x128xf32> to vector<16x128xf32>
    %57 = arith.maximumf %55, %56 : vector<16x128xf32>
    %58 = arith.subf %54, %57 : vector<16x128xf32>
    %cst_17 = arith.constant 0.000000e+00 : f32
    %59 = vector.broadcast %cst_17 : f32 to vector<16x128xf32>
    %60 = arith.maximumf %58, %59 : vector<16x128xf32>
    %61 = vector.broadcast %16 : vector<16x1xf32> to vector<16x128xf32>
    %62 = vector.broadcast %5 : vector<1x128xf32> to vector<16x128xf32>
    %63 = arith.minimumf %61, %62 : vector<16x128xf32>
    %64 = vector.broadcast %14 : vector<16x1xf32> to vector<16x128xf32>
    %65 = vector.broadcast %3 : vector<1x128xf32> to vector<16x128xf32>
    %66 = arith.maximumf %64, %65 : vector<16x128xf32>
    %67 = arith.subf %63, %66 : vector<16x128xf32>
    %cst_18 = arith.constant 0.000000e+00 : f32
    %68 = vector.broadcast %cst_18 : f32 to vector<16x128xf32>
    %69 = arith.maximumf %67, %68 : vector<16x128xf32>
    %70 = arith.mulf %60, %69 : vector<16x128xf32>
    %71 = vector.broadcast %17 : vector<16x1xf32> to vector<16x128xf32>
    %72 = vector.broadcast %6 : vector<1x128xf32> to vector<16x128xf32>
    %73 = arith.addf %71, %72 : vector<16x128xf32>
    %74 = arith.subf %73, %70 : vector<16x128xf32>
    %75 = vector.broadcast %15 : vector<16x1xf32> to vector<16x128xf32>
    %76 = vector.broadcast %4 : vector<1x128xf32> to vector<16x128xf32>
    %77 = arith.maximumf %75, %76 : vector<16x128xf32>
    %78 = vector.broadcast %13 : vector<16x1xf32> to vector<16x128xf32>
    %79 = vector.broadcast %2 : vector<1x128xf32> to vector<16x128xf32>
    %80 = arith.minimumf %78, %79 : vector<16x128xf32>
    %81 = arith.subf %77, %80 : vector<16x128xf32>
    %cst_19 = arith.constant 0.000000e+00 : f32
    %82 = vector.broadcast %cst_19 : f32 to vector<16x128xf32>
    %83 = arith.maximumf %81, %82 : vector<16x128xf32>
    %84 = vector.broadcast %16 : vector<16x1xf32> to vector<16x128xf32>
    %85 = vector.broadcast %5 : vector<1x128xf32> to vector<16x128xf32>
    %86 = arith.maximumf %84, %85 : vector<16x128xf32>
    %87 = vector.broadcast %14 : vector<16x1xf32> to vector<16x128xf32>
    %88 = vector.broadcast %3 : vector<1x128xf32> to vector<16x128xf32>
    %89 = arith.minimumf %87, %88 : vector<16x128xf32>
    %90 = arith.subf %86, %89 : vector<16x128xf32>
    %cst_20 = arith.constant 0.000000e+00 : f32
    %91 = vector.broadcast %cst_20 : f32 to vector<16x128xf32>
    %92 = arith.maximumf %90, %91 : vector<16x128xf32>
    %93 = arith.mulf %83, %92 : vector<16x128xf32>
    %94 = arith.mulf %70, %93 : vector<16x128xf32>
    %95 = arith.subf %93, %74 : vector<16x128xf32>
    %96 = arith.mulf %95, %74 : vector<16x128xf32>
    %97 = arith.subf %94, %96 : vector<16x128xf32>
    %98 = arith.mulf %74, %93 : vector<16x128xf32>
    %99 = tpu.reciprocal %98 {approx = true} : vector<16x128xf32> -> vector<16x128xf32>
    %100 = arith.mulf %97, %99 : vector<16x128xf32>
    %cst_21 = arith.constant 0.000000e+00 : f32
    %101 = vector.broadcast %cst_21 : f32 to vector<16x128xf32>
    %102 = arith.maximumf %100, %101 : vector<16x128xf32>
    %103 = arith.mulf %51, %102 : vector<16x128xf32>
    %c0_22 = arith.constant 0 : index
    %c0_23 = arith.constant 0 : index
    %c0_24 = arith.constant 0 : index
    %c0_25 = arith.constant 0 : index
    %104 = vector.load %arg7[%c0_22, %c0_23, %c0_24, %c0_25] : memref<1x1x16x128xf32, #tpu.memory_space<vmem>>, vector<1x1x16x128xf32>
    %105 = vector.shape_cast %104 : vector<1x1x16x128xf32> to vector<16x128xf32>
    %106 = vector.shape_cast %103 : vector<16x128xf32> to vector<1x1x16x128xf32>
    tpu.vector_store %arg7[%c0_22, %c0_23, %c0_24, %c0_25], %106 {strides = array<i32>} : memref<1x1x16x128xf32, #tpu.memory_space<vmem>>, vector<1x1x16x128xf32>,
    return
  }
  func.func @transform_0(%arg0: i32, %arg1: i32, %arg2: i32) -> (i32, i32, i32) {
    %c0_i32 = arith.constant 0 : i32
    %c0_i32_0 = arith.constant 0 : i32
    %c0_i32_1 = arith.constant 0 : i32
    return %arg0, %c0_i32, %c0_i32_0 : i32, i32, i32
  }
  func.func @transform_1(%arg0: i32, %arg1: i32, %arg2: i32) -> (i32, i32, i32) {
    %c0_i32 = arith.constant 0 : i32
    %c0_i32_0 = arith.constant 0 : i32
    %c0_i32_1 = arith.constant 0 : i32
    return %arg0, %c0_i32, %c0_i32_0 : i32, i32, i32
  }
  func.func @transform_2(%arg0: i32, %arg1: i32, %arg2: i32) -> (i32, i32, i32, i32) {
    %c0_i32 = arith.constant 0 : i32
    %c0_i32_0 = arith.constant 0 : i32
    return %arg0, %arg1, %arg2, %c0_i32 : i32, i32, i32, i32
  }
  func.func @transform_3(%arg0: i32, %arg1: i32, %arg2: i32) -> (i32, i32, i32, i32) {
    %c0_i32 = arith.constant 0 : i32
    %c0_i32_0 = arith.constant 0 : i32
    return %arg0, %arg1, %arg2, %c0_i32 : i32, i32, i32, i32
  }
  func.func @transform_4(%arg0: i32, %arg1: i32, %arg2: i32) -> (i32, i32, i32, i32) {
    %c0_i32 = arith.constant 0 : i32
    %c0_i32_0 = arith.constant 0 : i32
    return %arg0, %arg1, %arg2, %c0_i32 : i32, i32, i32, i32
  }
}

</mosaic_0001>

<bundles_post_ra>
// kernel: tpu_custom_call.1
= control target key start
LH: loop header
LB: loop body
LE: loop exit
PB: predicated region body
PF: predicated region fallthrough
CT: control target
= control target key end

     0   :  { %9 = vsyncpa [#allocation3], 0  ;;  %s1237_s0 = inlined_call_operand.vmem [shape: f32[2,9,128], index: 0, kind: input, shape index: {}]   ;;  %s1238_s1 = inlined_call_operand.vmem [shape: bf16[2,12,128], index: 1, kind: input, shape index: {}]   ;;  %s1239_s2 = inlined_call_operand.vmem [shape: f32[2,2,16,8], index: 2, kind: input, shape index: {}]   ;;  %s1240_s3 = inlined_call_operand.vmem [shape: bf16[2,2,16,12], index: 3, kind: input, shape index: {}]   ;;  %s1241_s4 = inlined_call_operand.hbm [shape: f32[2,2,16,128], index: 4, kind: output, shape index: {}]  }
   0x1   :  { %11 = vsyncpa [#allocation3 + $0x1], 0  ;;  %s1049_s15 = smov 0   ;;  %s1051_s16 = smov 0  }
   0x2   :  { %s1053_s17 = smov 0   ;;  %s1055_s18 = smov 0  }
   0x3   :  { %s1057_s19 = smov 0   ;;  %s1059_s20 = smov 0  }
   0x4   :  { %s1061_s21 = smov 0   ;;  %s1063_s22 = smov 0  }
   0x5 LB: > { %1246 = sst [smem:[#allocation5_spill]] %s1001_s20  ;;  %s771_s23 = sadd.s32 4294967295, %s1009_s22   ;;  %s1009_s22 = sphi %s1063_s22, %s17_s22   ;;  %s1005_s21 = sphi %s1061_s21, %s1255_s21   ;;  %s1001_s20 = sphi %s1059_s20, %s1254_s20   ;;  %s997_s19 = sphi %s1057_s19, %s1253_s19   ;;  %s993_s18 = sphi %s1055_s18, %s1252_s18   ;;  %s989_s17 = sphi %s1053_s17, %s1258_s17   ;;  %s985_s16 = sphi %s1051_s16, %s1257_s16   ;;  %s981_s15 = sphi %s1049_s15, %s1256_s15  }
   0x6   : > { %1247 = sst [smem:[#allocation6_spill]] %s1005_s21  ;;  %s772_s24 = sadd.s32 4294967294, %s1009_s22  }
   0x7   : > { %s32_s25 = sadd.s32 1, %s1001_s20  ;;  %s36_s26 = sadd.s32 1, %s1005_s21 }
   0x8   : > { %p34_p0 = scmp.ge.s32.totalorder %s32_s25, 2  ;;  %p169_p1 = scmp.ne.s32.totalorder %s989_s17, %s985_s16 }
   0x9   : > { %p170_p2 = scmp.eq.s32.totalorder %s771_s23, 3  ;;  %p175_p5 = scmp.ne.s32.totalorder %s985_s16, %s981_s15 }
   0xa   : > { %s1260_s25 = smov (%p34_p0, %s32_s25), 0  ;;  %s1262_s26 = smov (!%p34_p0, %s36_s26), %s1005_s21 }
   0xb   : > { %1248 = sst [smem:[#allocation7_spill]] %s1260_s25  ;;  %s153_s27 = ssub.s32 %s1001_s20, %s1260_s25 }
   0xc   : > { %p1100_p3 = por %p170_p2, %p169_p1  ;;  %p38_p4 = scmp.ge.s32.totalorder %s1262_s26, 2 }
   0xd   : > { %p176_p6 = scmp.eq.s32.totalorder %s772_s24, 3  ;;  %p775_p7 = scmp.ge.s32.totalorder %s1009_s22, 1 }
   0xe   : > { %s1264_s26 = smov (%p38_p4, %s1262_s26), 0  ;;  %p244_p9 = scmp.lt.s32.totalorder %s1009_s22, 5 }
   0xf   : > { %1250 = sst [smem:[#allocation8_spill]] %s1264_s26  ;;  %p1109_p8 = por %p176_p6, %p175_p5 }
  0x10   : > { %s152_s30 = ssub.s32 %s1005_s21, %s1264_s26  ;;  %s159_s5 = sadd.s32 1, %s989_s17 }
  0x11   : > { %s154_s6 = sor.u32 %s153_s27, %s152_s30  ;;  %p245_p10 = pnand %p775_p7, %p244_p9 }
  0x12   : > { %p157_p11 = scmp.eq.s32.totalorder %s154_s6, 0  ;;  %p301_p12 = scmp.lt.s32.totalorder (!%p245_p10), %s997_s19, 1 }
  0x13   : > { %248 = sbr.rel (%p245_p10) target bundleno = 290 (0x122), region = 36  ;;  %p314_p13 = scmp.lt.s32.totalorder (!%p245_p10), %s993_s18, 1 }
  0x14   : > { %s1118_s7 = scalar_select %p157_p11, %s989_s17, %s159_s5  }
  0x15   : > { %s1021_s5 = smov (!%p245_p10), [#allocation2]  }
  0x16   : > { %s921_s6 = sshll.u32 (!%p245_p10), %s1021_s5, 4  ;;  %s922_s6 = int_to_ptr.vmem [resolvable:$false] %s921_s6 }
  0x18   : > { %v1011_v0 = vmov 0.0   ;;  %vm1012_vm0 = vmmov 0   ;;  %s1123_s8 = scalar_select %p301_p12, %s997_s19, 1  ;;  %v1013_v1 = vmov 2   ;;  %v1014_v2 = vmov 7  }
  0x19   : > { %801 = vmatprep.subr.bf16.mxu0 %v1011_v0  ;;  %803 = vmatprep.mubr.msk.bf16.mxu0 %vm1012_vm0, %v1011_v0  ;;  %s315_s9 = scalar_select %p314_p13, %s993_s18, 1  ;;  %vm401_vm1 = vcmask 1045504   ;;  %vm397_vm2 = vcmask 97280   ;;  %v1015_v8 = vmov 0   ;;  %v1016_v9 = vmov 3  }
  0x1a   : > { %891 = vset.pattern.permute.xlu1 %v1013_v1  ;;  %890 = vset.pattern.permute.xlu0 %v1014_v2  ;;  %s798_s10 = sshll.u32 %s1123_s8, 3  ;;  %s782_s11 = sshll.u32 %s1123_s8, 2  ;;  %v1017_v10 = vmov 1   ;;  %v1018_v11 = vmov 5   ;;  %v1019_v12 = vmov 6   ;;  %v1020_v13 = vmov 4  }
  0x1b   : > { %s310_s14 = scalar_lea.vmem %s1238_s1, %s798_s10  ;;  %s781_s23 = sshll.u32 %s315_s9, 1  ;;  %v355_v19 = vlaneseq }
  0x1c   : > { %v903_v3 = vld [vmem:[%s310_s14] sm:$0x3f]   ;;  %s321_s24 = sadd.s32 %s782_s11, %s781_s23  ;;  %s792_s9 = sshll.u32 %s993_s18, 1 }
  0x1d   : > { %s783_s27 = sshll.u32 %s321_s24, 3  ;;  %s786_s30 = sshll.u32 %s321_s24, 2  ;;  %v403_v4 = vsel %vm401_vm1, %v903_v3, 0  ;;  %v1142_v21 = vshrl.u32 %v355_v19, 7 }
  0x1e   : > { %s323_s26 = scalar_lea.vmem %s1239_s2, %s783_s27  ;;  %s337_s20 = scalar_lea.vmem %s1240_s3, %s786_s30  ;;  %802 = vmatpush3.bf16.msra.mxu0 %v403_v4 }
  0x1f   : > { %v343_v5 = vld [vmem:[%s323_s26] sm:$0xff]  ;;  %v344_v7 = vld [vmem:[%s323_s26 + $0x8] sm:$0xff]  ;;  %v502_v24 = vsub.s32 2, %v1142_v21  ;;  %v516_v25 = vsub.s32 0, %v1142_v21  ;;  %v534_v27 = vsub.s32 3, %v1142_v21  ;;  %v548_v28 = vsub.s32 1, %v1142_v21 }
  0x20   : > { %v904_v6 = vld [vmem:[%s337_s20] sm:$0xff]   ;;  %493 = vperm.xlu1 %891, %v343_v5   ;;  %447 = vperm.xlu0 %890, %v343_v5   ;;  %s797_s20 = sshll.u32 %s1123_s8, 4  ;;  %v357_v43 = vsub.s32 5, %v1142_v21  ;;  %v568_v45 = vsub.s32 4, %v1142_v21  ;;  %v373_v54 = vsub.s32 6, %v1142_v21  ;;  %s298_s8 = sand.u32 1, %s985_s16  }
  0x21   : > { %804 = vmatmul.mubr.msk.bf16.vlgmr.msra.gmra.mxu0 %vm397_vm2, %v904_v6  ;;  %s305_s26 = scalar_lea.vmem %s1237_s0, %s797_s20  ;;  %s793_s10 = sshll.u32 %s997_s19, 2 }
  0x22   : > { %v1151_v26 = vld [vmem:[%s305_s26] sm:$0xff]  ;;  %v790_v35 = vld [vmem:[%s305_s26 + $0x8] ss:$0 sm:$0xff]  ;;  %s776_s11 = sshll.u32 %s298_s8, 4  ;;  %s627_s12 = sadd.s32 %s793_s10, %s792_s9 }
  0x23   : > { %v503_v30 = vrot.slane %v1151_v26, %v502_v24  ;;  %v517_v31 = vrot.slane %v1151_v26, %v516_v25  ;;  %v535_v33 = vrot.slane %v1151_v26, %v534_v27  ;;  %v549_v34 = vrot.slane %v1151_v26, %v548_v28  ;;  %s794_s13 = sshll.u32 %s627_s12, 7  ;;  %s300_s14 = scalar_lea.vmem [#allocation2], %s776_s11 }
  0x24   : > { %497 = vperm.xlu1 %891, %v344_v7   ;;  %451 = vperm.xlu0 %890, %v344_v7   ;;  %v569_v63 = vrot.slane %v1151_v26, %v568_v45  ;;  %s630_s23 = sshll.u32 %s300_s14, 4  ;;  %s1182_s18 = scalar_lea.hbm %s1241_s4, %s794_s13  ;;  %s1184_s23 = int_to_ptr.vmem [resolvable:$true] %s630_s23 }
  0x25   : > { %s1186_s19 = scalar_lea.sflag [#allocation3], %s298_s8  ;;  %s917_s30 = scalar_lea.vmem %s1184_s23, 256 }
  0x26   : > { %p918_p0 = scmp.ne.s32.totalorder %s1184_s23, %s917_s30  ;;  %s923_s20 = scalar_lea.vmem %s922_s6, 512 }
  0x27   : > { %p924_p4 = scmp.lt.s32.totalorder %s1184_s23, %s922_s6  ;;  %p925_p5 = scmp.lt.s32.totalorder %s923_s20, %s917_s30 }
  0x28   : > { %893 = vset.pattern.permute.xlu1 %v1015_v8  ;;  %892 = vset.pattern.permute.xlu0 %v1015_v8  ;;  %p919_p1 = pnand %p918_p0, %p1100_p3 }
  0x29   : > { %511 = vperm.xlu1 %893, %v344_v7   ;;  %507 = vperm.xlu0 %892, %v343_v5   ;;  %p926_p6 = por %p925_p5, %p924_p4 }
  0x2a   : > { %p920_p2 = pneg %p919_p1 }
  0x2c   : > { %p927_p7 = pnand %p926_p6, %p920_p2 }
  0x2d   : > { %894 = vset.pattern.permute.xlu1 %v1016_v9  ;;  %895 = vset.pattern.permute.xlu0 %v1016_v9 }
  0x2e   : > { %525 = vperm.xlu1 %894, %v343_v5   ;;  %529 = vperm.xlu0 %895, %v344_v7  }
  0x32   : > { %896 = vset.pattern.permute.xlu1 %v1017_v10  ;;  %897 = vset.pattern.permute.xlu0 %v1018_v11 }
  0x33   : > { %539 = vperm.xlu1 %896, %v343_v5   ;;  %347 = vperm.xlu0 %897, %v343_v5  }
  0x37   : > { %543 = vperm.xlu1 %896, %v344_v7   ;;  %900 = vset.pattern.permute.xlu0 %v1019_v12 }
  0x38   : > { %368 = vperm.xlu0 %900, %v344_v7  }
  0x3b   : > { %898 = vset.pattern.permute.xlu1 %v1018_v11 }
  0x3c   : > { %352 = vperm.xlu1 %898, %v344_v7   ;;  %902 = vset.pattern.permute.xlu0 %v1020_v13 }
  0x40   : > { %899 = vset.pattern.permute.xlu1 %v1019_v12 }
  0x41   : > { %364 = vperm.xlu1 %899, %v343_v5  }
  0x45   : > { %901 = vset.pattern.permute.xlu1 %v1020_v13 }
  0x46   : > { %559 = vperm.xlu1 %901, %v343_v5  }
  0x4a   : > { %563 = vperm.xlu1 %901, %v344_v7  }
  0x9b   : > { %v494_v14 = vpop.permute.xlu1 %493  ;;  %v448_v18 = vpop.permute.xlu0 %447 }
  0x9c   : > { %v504_v36 = vmin.f32 %v494_v14, %v503_v30  ;;  %v574_v41 = vmax.f32 %v494_v14, %v503_v30  ;;  %v458_v42 = vadd.f32 %v790_v35, %v448_v18 }
  0x9f   : > { %v1137_v15 = vpop.permute.xlu1 %497  ;;  %v452_v22 = vpop.permute.xlu0 %451 }
  0xa0   : > { %v505_v47 = vmin.f32 %v1137_v15, %v503_v30  ;;  %v575_v60 = vmax.f32 %v1137_v15, %v503_v30  ;;  %v459_v62 = vadd.f32 %v790_v35, %v452_v22 }
  0xa4   : > { %v1139_v16 = vpop.permute.xlu1 %511  ;;  %v508_v29 = vpop.permute.xlu0 %507 }
  0xa5   : > { %v518_v37 = vmax.f32 %v508_v29, %v517_v31  ;;  %v519_v48 = vmax.f32 %v1139_v16, %v517_v31  ;;  %v576_v49 = vmin.f32 %v508_v29, %v517_v31  ;;  %v577_v61 = vmin.f32 %v1139_v16, %v517_v31 }
  0xa6   : > { %v358_v16 = vrot.slane %v1151_v26, %v357_v43 }
  0xa7   : > { %v520_v53 = vsub.f32 %v504_v36, %v518_v37  ;;  %v521_v1 = vsub.f32 %v505_v47, %v519_v48  ;;  %v578_v2 = vsub.f32 %v574_v41, %v576_v49  ;;  %v579_v15 = vsub.f32 %v575_v60, %v577_v61 }
  0xa9   : > { %v526_v17 = vpop.permute.xlu1 %525  ;;  %v530_v40 = vpop.permute.xlu0 %529  ;;  %v522_v7 = vmax.f32 %v520_v53, 0.0  ;;  %v523_v19 = vmax.f32 %v521_v1, 0.0  ;;  %v580_v22 = vmax.f32 %v578_v2, 0.0  ;;  %v581_v31 = vmax.f32 %v579_v15, 0.0 }
  0xaa   : > { %v536_v38 = vmin.f32 %v526_v17, %v535_v33  ;;  %v582_v51 = vmax.f32 %v526_v17, %v535_v33  ;;  %v537_v58 = vmin.f32 %v530_v40, %v535_v33  ;;  %v583_v8 = vmax.f32 %v530_v40, %v535_v33 }
  0xab   : > { %v374_v17 = vrot.slane %v1151_v26, %v373_v54 }
  0xae   : > { %v540_v20 = vpop.permute.xlu1 %539  ;;  %v348_v14 = vpop.permute.xlu0 %347 }
  0xaf   : > { %v550_v39 = vmax.f32 %v540_v20, %v549_v34  ;;  %v584_v52 = vmin.f32 %v540_v20, %v549_v34  ;;  %v359_v30 = vsub.f32 %v348_v14, %v358_v16 }
  0xb1   : > { %v552_v56 = vsub.f32 %v536_v38, %v550_v39  ;;  %v586_v5 = vsub.f32 %v582_v51, %v584_v52  ;;  %v361_v41 = vand.u32 2147483647, %v359_v30 }
  0xb2   : > { %v1147_v23 = vpop.permute.xlu1 %543 }
  0xb3   : > { %v551_v57 = vmax.f32 %v1147_v23, %v549_v34  ;;  %v585_v6 = vmin.f32 %v1147_v23, %v549_v34  ;;  %v554_v11 = vmax.f32 %v552_v56, 0.0  ;;  %v588_v20 = vmax.f32 %v586_v5, 0.0  ;;  %v369_v34 = vpop.permute.xlu0 %368 }
  0xb5   : > { %v553_v12 = vsub.f32 %v537_v58, %v551_v57  ;;  %v587_v24 = vsub.f32 %v583_v8, %v585_v6  ;;  %v556_v25 = vmul.f32 %v554_v11, %v522_v7  ;;  %v590_v33 = vmul.f32 %v588_v20, %v580_v22 }
  0xb7   : > { %v1157_v32 = vpop.permute.xlu1 %352  ;;  %v555_v23 = vmax.f32 %v553_v12, 0.0  ;;  %v589_v35 = vmax.f32 %v587_v24, 0.0  ;;  %v592_v2 = vmul.f32 %v590_v33, %v556_v25 }
  0xb8   : > { %v360_v39 = vsub.f32 %v1157_v32, %v358_v16 }
  0xb9   : > { %v557_v37 = vmul.f32 %v555_v23, %v523_v19  ;;  %v591_v43 = vmul.f32 %v589_v35, %v581_v31 }
  0xba   : > { %v362_v48 = vand.u32 2147483647, %v360_v39 }
  0xbb   : > { %v593_v7 = vmul.f32 %v591_v43, %v557_v37 }
  0xbc   : > { %v365_v44 = vpop.permute.xlu1 %364 }
  0xbd   : > { %v375_v29 = vsub.f32 %v365_v44, %v374_v17 }
  0xbf   : > { %v377_v40 = vand.u32 2147483647, %v375_v29 }
  0xc1   : > { %v560_v9 = vpop.permute.xlu1 %559  ;;  %v379_v49 = vadd.f32 %v377_v40, %v361_v41 }
  0xc2   : > { %v570_v27 = vadd.f32 %v569_v63, %v560_v9  ;;  %v488_v9 = vsub.s32 7, %v1142_v21 }
  0xc3   : > { %v381_v32 = vadd.f32 1.0, %v379_v49 }
  0xc4   : > { %v572_v36 = vsub.f32 %v570_v27, %v556_v25 }
  0xc5   : > { %v564_v28 = vpop.permute.xlu1 %563 }
  0xc6   : > { %v571_v38 = vadd.f32 %v569_v63, %v564_v28  ;;  %v600_v45 = vmul.f32 %v590_v33, %v572_v36 }
  0xe1   : > { %v439_v46 = vpop.f32.mrf.mxu0 }
  0xe2   : > { %v460_v50 = vmul.f32 2.0, %v439_v46  ;;  %v573_v46 = vsub.f32 %v571_v38, %v557_v37 }
  0xe3   : > { %v805_v55 = vpop.f32.mrf.mxu0 }
  0xe4   : > { %v462_v59 = vsub.f32 %v458_v42, %v460_v50  ;;  %v376_v42 = vsub.f32 %v369_v34, %v374_v17  ;;  %v601_v52 = vmul.f32 %v591_v43, %v573_v46 }
  0xe5   : > { %v442_v0 = vpop.f32.mrf.mxu0 }
  0xe6   : > { %v464_v3 = vmax.f32 %v462_v59, 0.0  ;;  %v461_v4 = vmul.f32 2.0, %v442_v0  ;;  %v378_v50 = vand.u32 2147483647, %v376_v42  ;;  %v594_v59 = vsub.f32 %v590_v33, %v572_v36 }
  0xe7   : > { %v806_v10 = vpop.f32.mrf.mxu0 }
  0xe8   : > { %905 = vrsqrt.f32 %v464_v3  ;;  %v463_v13 = vsub.f32 %v459_v62, %v461_v4  ;;  %vm468_vm3 = vcmp.eq.f32.partialorder %v464_v3, inf  ;;  %v471_v51 = vand.u32 2147483648, %v464_v3 }
  0xe9   : > { %vm470_vm4 = vcmp.eq.f32.partialorder %v464_v3, 0.0  ;;  %v380_v57 = vadd.f32 %v378_v50, %v362_v48  ;;  %v595_v4 = vsub.f32 %v591_v43, %v573_v46 }
  0xea   : > { %v465_v18 = vmax.f32 %v463_v13, 0.0  ;;  %v489_v13 = vrot.slane %v1151_v26, %v488_v9 }
  0xeb   : > { %v382_v0 = vadd.f32 1.0, %v380_v57  ;;  %v597_v8 = vmul.f32 %v595_v4, %v573_v46 }
  0xec   : > { %907 = vrsqrt.f32 %v465_v18  ;;  %vm475_vm5 = vcmp.eq.f32.partialorder %v465_v18, inf  ;;  %v478_v60 = vand.u32 2147483648, %v465_v18  ;;  %vm477_vm6 = vcmp.eq.f32.partialorder %v465_v18, 0.0 }
  0xed   : > { %909 = vrcp.f32 %v600_v45  ;;  %v599_v12 = vsub.f32 %v593_v7, %v597_v8 }
  0xee   : > { %911 = vrcp.f32 %v601_v52 }
  0xf5   : > { %v906_v47 = vpop.eup %905 }
  0xf6   : > { %v467_v44 = vmul.f32 %v906_v47, %v464_v3 }
  0xf8   : > { %v469_v53 = vsel %vm468_vm3, %v464_v3, %v467_v44  ;;  %v596_v3 = vmul.f32 %v594_v59, %v572_v36 }
  0xf9   : > { %v908_v54 = vpop.eup %907  ;;  %v472_v55 = vsel %vm470_vm4, %v471_v51, %v469_v53 }
  0xfa   : > { %v480_v56 = vadd.f32 1.0, %v472_v55  ;;  %v474_v58 = vmul.f32 %v908_v54, %v465_v18  ;;  %v598_v6 = vsub.f32 %v592_v2, %v596_v3  ;;  %v910_v10 = vpop.eup %909 }
  0xfb   : > { %v912_v14 = vpop.eup %911 }
  0xfc   : > { %v482_v61 = vmul.f32 %v480_v56, %v381_v32  ;;  %v476_v62 = vsel %vm475_vm5, %v465_v18, %v474_v58  ;;  %v604_v11 = vmul.f32 %v910_v10, %v598_v6  ;;  %v605_v17 = vmul.f32 %v912_v14, %v599_v12 }
  0xfd   : > { %v479_v63 = vsel %vm477_vm6, %v478_v60, %v476_v62 }
  0xfe   : > { %913 = vrcp.f32 %v482_v61  ;;  %v481_v1 = vadd.f32 1.0, %v479_v63  ;;  %v606_v16 = vmax.f32 %v604_v11, 0.0  ;;  %v607_v20 = vmax.f32 %v605_v17, 0.0 }
 0x100   : > { %v483_v5 = vmul.f32 %v481_v1, %v382_v0 }
 0x102   : > { %915 = vrcp.f32 %v483_v5 }
 0x10b   : > { %v914_v15 = vpop.eup %913 }
 0x10c   : > { %v490_v18 = vmul.f32 %v914_v15, %v489_v13 }
 0x10e   : > { %v608_v19 = vmul.f32 %v606_v16, %v490_v18 }
 0x10f   : > { %v916_v21 = vpop.eup %915 }
 0x110   : > { %v491_v22 = vmul.f32 %v916_v21, %v489_v13  ;;  %610 = vst [vmem:[%s300_s14] sm:$0xff] %v608_v19 }
 0x112   : > { %v609_v26 = vmul.f32 %v607_v20, %v491_v22 }
 0x114   : > { %611 = vst [vmem:[%s300_s14 + $0x8] sm:$0xff] %v609_v26 }
 0x115   : > { %930 = shalt.err (!%p927_p7)
}
 0x116   : > { %s931_s21 = scalar_lea.hbm %s1182_s18, 256  ;;  %s935_s8 = scalar_lea.hbm %s1241_s4, 1024 }
 0x117   : > { %p932_p9 = scmp.ne.s32.totalorder %s1182_s18, %s931_s21  ;;  %p936_p12 = scmp.lt.s32.totalorder %s1182_s18, %s1241_s4 }
 0x118   : > { %p937_p13 = scmp.lt.s32.totalorder %s935_s8, %s931_s21 }
 0x119   : > { %p933_p10 = pnand %p932_p9, %p1100_p3 }
 0x11a   : > { %p938_p0 = por %p937_p13, %p936_p12 }
 0x11b   : > { %p934_p11 = pneg %p933_p10 }
 0x11d   : > { %p939_p1 = pnand %p938_p0, %p934_p11 }
 0x11f   : > { %942 = shalt.err (!%p939_p1)
}
 0x120   : > { %s1022_s11 = smov 128   ;;  %s1023_s12 = smov 8  }
 0x121   : > { %807 = dma.vmem_to_hbm [thread:$0]  (%p1100_p3), %s1184_s23, 256, %s1182_s18, %s1186_s19, %s1022_s11, %s1022_s11, %s1023_s12  }
 0x122 PF: > { %p813_p2 = scmp.ge.s32.totalorder %s1009_s22, 2  ;;  %s645_s13 = sand.u32 1, %s981_s15  }
 0x123   : > { %s646_s14 = scalar_lea.sflag [#allocation3], %s645_s13 }
 0x124   : > { %p810_p4 = pnand %p813_p2, %p1109_p8 }
 0x126   : > { %p811_p5 = pneg %p810_p4 }
 0x128   : > { %976 = dma.done.wait (%p811_p5), %s646_s14, 256  }
 0x129   : > { %978 = vsyncadd (%p811_p5), %s646_s14, 4294967040  ;;  %s17_s22 = sadd.s32 1, %s1009_s22   ;;  %s1252_s18 = sld [smem:[#allocation5_spill]] }
 0x12a   : > { %p14_p6 = scmp.ge.s32.totalorder %s17_s22, 6   ;;  %s1253_s19 = sld [smem:[#allocation6_spill]] }
 0x12b   : > { %s1254_s20 = sld [smem:[#allocation7_spill]]  ;;  %s1256_s15 = smov %s985_s16 }
 0x12c   : > { %s1255_s21 = sld [smem:[#allocation8_spill]]  ;;  %s1257_s16 = smov %s989_s17 }
 0x12d   : > { %s1258_s17 = smov %s1118_s7  ;;  %16 = sbr.rel (!%p14_p6) target bundleno = 5 (0x5), region = 80 }
 0x132   :  { %651 = vsyncpa [#allocation3], 1 }
 0x133   :  { %653 = vsyncpa [#allocation3 + $0x1], 1 }

</bundles_post_ra>
